<compile_context>
chip_gen: v6e
topology: v6e:2x2x1
jax: 0.10.0
libtpu: 0.0.40
codegen_flags: <defaults>
</compile_context>

<pallas_src>
import numpy as np
import jax
import jax.numpy as jnp
from jax.experimental import pallas as pl
from jax.experimental.pallas import tpu as pltpu


def _round_up(a, b):
    return ((a + b - 1) // b) * b


def _make_kan_conv_kernel(grid_pts, spline_order):
    """Build the Pallas kernel body. Knots are baked in as static floats."""
    g = [float(v) for v in grid_pts]
    Ng = len(g)
    S = int(spline_order)

    def kernel(xt_ref, w_ref, out_ref):
        # xt_ref : (CKp, TM)   f32  patch tile (taps on sublanes, rows on lanes)
        # w_ref  : (O_pad, n_feat*CKp) bf16 packed KAN weights (VMEM-resident)
        # out_ref: (O_pad, TM) f32
        x = xt_ref[...]

        # ---- base branch: SiLU(x).  exp -> EUP, approx reciprocal -> EUP,
        #      which keeps the saturated VALU bundle slot free. ----
        silu = x * pl.reciprocal(1.0 + jnp.exp(-x), approx=True)

        # ---- degree-0 indicators: keep them boolean; the float conversion is
        #      folded into the degree-1 recursion level below. ----
        masks = [(x >= g[t]) & (x < g[t + 1]) for t in range(Ng - 1)]

        if S == 0:
            bases = [jnp.where(m, jnp.float32(1.0), jnp.float32(0.0)) for m in masks]
        else:
            # degree 1: fold the indicator into the select; statically
            # precomputed knot reciprocals -> only muls hit the VALU.
            bases = []
            for t in range(Ng - 2):
                ra = 1.0 / (g[t + 1] - g[t])
                rb = 1.0 / (g[t + 2] - g[t + 1])
                left = jnp.where(masks[t], (x - g[t]) * ra, 0.0)
                right = jnp.where(masks[t + 1], (g[t + 2] - x) * rb, 0.0)
                bases.append(left + right)
            # degrees 2..S: standard Cox-de-Boor with static reciprocals.
            for k in range(2, S + 1):
                new_bases = []
                for t in range(Ng - 1 - k):
                    ra = 1.0 / (g[t + k] - g[t])
                    rb = 1.0 / (g[t + k + 1] - g[t + 1])
                    new_bases.append((x - g[t]) * ra * bases[t]
                                     + (g[t + k + 1] - x) * rb * bases[t + 1])
                bases = new_bases

        # ---- fused contraction: sublane-aligned concat (each feature block is
        #      CKp rows, a multiple of 8) -> ONE bf16 MXU matmul, f32 acc. ----
        feats = jnp.concatenate([silu] + bases, axis=0)          # (n_feat*CKp, TM) f32
        feats = feats.astype(jnp.bfloat16)
        out_ref[...] = jnp.dot(w_ref[...], feats,
                               preferred_element_type=jnp.float32)

    return kernel


class KANConv1D:
    """JAX/Pallas re-implementation of KAN_Convolution.forward (KConv1d)."""

    def __init__(self, in_channels, output_channels, kernel, stride=1, padding=0,
                 dilation=1, grid_size=5, spline_order=3, grid_range=(-1.0, 1.0),
                 key=None):
        self.in_channels = in_channels
        self.output_channels = output_channels
        self.kernel = kernel
        self.stride = stride
        self.padding = padding
        self.dilation = dilation
        self.grid_size = grid_size
        self.spline_order = spline_order

        # KANLinear grid (identical for every input feature, as in efficient-kan)
        h = (grid_range[1] - grid_range[0]) / grid_size
        self.grid_pts = (
            np.arange(-spline_order, grid_size + spline_order + 1, dtype=np.float64) * h
            + grid_range[0]
        ).astype(np.float32)

        O, C, K = output_channels, in_channels, kernel
        self.CK = C * K
        self.CKp = _round_up(self.CK, 8)           # sublane-aligned per-feature block
        self.O_pad = _round_up(O, 16)              # sublane-aligned output rows
        n_bases = grid_size + spline_order         # spline coefficients per tap
        self.n_feat = 1 + n_bases                  # [SiLU] + splines
        self.KTOT = self.n_feat * self.CKp

        # Deterministic parameter init (one KANLinear(K -> 1) per (out, in) pair):
        #   base_weight    (O, C, K)
        #   spline_weight  (O, C, K, n_bases)
        #   spline_scaler  (O, C, K)
        if key is None:
            key = jax.random.PRNGKey(0)
        k1, k2, k3 = jax.random.split(key, 3)
        base_w = jax.random.normal(k1, (O, C, K), jnp.float32) / np.sqrt(K)
        spline_w = jax.random.normal(k2, (O, C, K, n_bases), jnp.float32) * 0.1
        spline_scaler = 1.0 + 0.1 * jax.random.normal(k3, (O, C, K), jnp.float32)
        scaled_spline_w = spline_w * spline_scaler[..., None]        # (O,C,K,n_bases)
        self.base_w = base_w
        self.scaled_spline_w = scaled_spline_w

        # Pack weights once as a single (O_pad, n_feat*CKp) bf16 matrix;
        # feature block 0 = SiLU base weights, blocks 1..n_bases = spline coeffs.
        blocks = [base_w.reshape(O, self.CK)]
        for gix in range(n_bases):
            blocks.append(scaled_spline_w[..., gix].reshape(O, self.CK))
        padded = [jnp.pad(b, ((0, self.O_pad - O), (0, self.CKp - self.CK)))
                  for b in blocks]
        self.W_packed = jnp.concatenate(padded, axis=1).astype(jnp.bfloat16)

    def __call__(self, x):
        B, C, L = x.shape
        assert C == self.in_channels
        K, s, p, d = self.kernel, self.stride, self.padding, self.dilation
        # Same output-length formula as calc_out_dims_1d (uses dilation) ...
        P = int(np.floor((L + 2 * p - d * (K - 1) - 1) / s)) + 1
        if p > 0:
            x = jnp.pad(x, ((0, 0), (0, 0), (p, p)))
        # ... but KConv1d slices input[..., i*stride : i*stride + K] (taps are NOT
        # dilated) — reproduced exactly.
        tap_idx = np.arange(P)[:, None] * s + np.arange(K)[None, :]  # (P, K)
        patches = x[:, :, tap_idx]                                   # (B, C, P, K)
        # Transposed im2col: rows = (c, k), cols = (b, p)  -> lane dim is B*P.
        patches_t = jnp.transpose(patches, (1, 3, 0, 2)).reshape(C * K, B * P)
        patches_t = patches_t.astype(jnp.float32)

        M = B * P
        CK, CKp, O, O_pad = self.CK, self.CKp, self.output_channels, self.O_pad
        KTOT = self.KTOT

        TM = min(512, _round_up(max(M, 1), 128))     # lane tile (multiple of 128)
        Mp = _round_up(M, TM)
        patches_t = jnp.pad(patches_t, ((0, CKp - CK), (0, Mp - M)))

        kern = _make_kan_conv_kernel(self.grid_pts, self.spline_order)

        cost = pl.CostEstimate(
            flops=2 * O_pad * KTOT * Mp + 230 * CKp * Mp,
            transcendentals=2 * CKp * Mp,
            bytes_accessed=int(patches_t.size) * 4 + int(self.W_packed.size) * 2
                           + O_pad * Mp * 4,
        )

        out_t = pl.pallas_call(
            kern,
            out_shape=jax.ShapeDtypeStruct((O_pad, Mp), jnp.float32),
            grid=(Mp // TM,),
            in_specs=[
                pl.BlockSpec((CKp, TM), lambda i: (0, i)),        # patch tiles
                pl.BlockSpec((O_pad, KTOT), lambda i: (0, 0)),    # weights stay resident
            ],
            out_specs=pl.BlockSpec((O_pad, TM), lambda i: (0, i)),
            compiler_params=pltpu.CompilerParams(
                dimension_semantics=("parallel",),                # megacore on v7x
                vmem_limit_bytes=64 * 1024 * 1024,                # actual use ~ a few MiB
            ),
            cost_estimate=cost,
        )(patches_t, self.W_packed)

        # (O_pad, Mp) -> (B, O, P), matching the PyTorch output (batch, out_ch, len_out)
        out = out_t[:O, :M].reshape(O, B, P)
        return jnp.transpose(out, (1, 0, 2))


def _reference(x, conv: KANConv1D):
    """Pure-JAX f32 reference with identical math (exact sigmoid, f32 matmuls)."""
    B, C, L = x.shape
    K, s, p, d = conv.kernel, conv.stride, conv.padding, conv.dilation
    P = int(np.floor((L + 2 * p - d * (K - 1) - 1) / s)) + 1
    if p > 0:
        x = jnp.pad(x, ((0, 0), (0, 0), (p, p)))
    tap_idx = np.arange(P)[:, None] * s + np.arange(K)[None, :]
    patches = jnp.transpose(x[:, :, tap_idx], (0, 2, 1, 3)).reshape(B * P, C * K)
    patches = patches.astype(jnp.float32)

    g = conv.grid_pts
    Ng = len(g)
    S = conv.spline_order
    silu = patches * jax.nn.sigmoid(patches)
    bases = [((patches >= g[t]) & (patches < g[t + 1])).astype(jnp.float32)
             for t in range(Ng - 1)]
    for k in range(1, S + 1):
        bases = [
            (patches - g[t]) / (g[t + k] - g[t]) * bases[t]
            + (g[t + k + 1] - patches) / (g[t + k + 1] - g[t + 1]) * bases[t + 1]
            for t in range(Ng - 1 - k)
        ]
    O = conv.output_channels
    out = silu @ conv.base_w.reshape(O, C * K).T
    for gix in range(conv.grid_size + conv.spline_order):
        out = out + bases[gix] @ conv.scaled_spline_w[..., gix].reshape(O, C * K).T
    return jnp.transpose(out.reshape(B, P, O), (0, 2, 1))


if __name__ == "__main__":
    key = jax.random.PRNGKey(0)
    kx, kp = jax.random.split(key)

    # Small shapes consistent with the module: x is (batch, in_channels, length)
    B, C, L = 2, 4, 16
    O, K = 3, 3
    x = 0.5 * jax.random.normal(kx, (B, C, L), jnp.float32)

    conv = KANConv1D(in_channels=C, output_channels=O, kernel=K,
                     stride=1, padding=0, dilation=1,
                     grid_size=5, spline_order=3, key=kp)

    out = conv(x)
    out = jax.block_until_ready(out)

    expected_len = int(np.floor((L + 0 - 1 * (K - 1) - 1) / 1)) + 1  # 14
    assert out.shape == (B, O, expected_len), out.shape
    assert out.dtype == jnp.float32

    ref = jax.block_until_ready(_reference(x, conv))
    # Kernel uses bf16 MXU inputs (f32 accumulate) + EUP approx reciprocal for
    # SiLU, so compare against the exact-f32 reference at bf16-level tolerance.
    np.testing.assert_allclose(np.asarray(out), np.asarray(ref), rtol=2e-2, atol=2e-2)

    print("KERNEL_OK")
</pallas_src>

<mosaic_0001>
module attributes {stable_mosaic.version = 11 : i64} {
  func.func @kernel(%arg0: i32, %arg1: memref<16x128xf32, #tpu.memory_space<vmem>>, %arg2: memref<16x144xbf16, #tpu.memory_space<vmem>>, %arg3: memref<16x128xf32, #tpu.memory_space<vmem>>) attributes {dimension_semantics = [#tpu.dimension_semantics<parallel>], iteration_bounds = array<i64: 1>, scalar_prefetch = 0 : i64, scratch_operands = 0 : i64, tpu.core_type = #tpu.core_type<tc>, window_params = [{transform_indices = @transform_0, window_bounds = array<i64: 16, 128>}, {pipeline_mode = #tpu.pipeline_mode<synchronous>, transform_indices = @transform_1, window_bounds = array<i64: 16, 144>}, {transform_indices = @transform_2, window_bounds = array<i64: 16, 128>}]} {
    %c0 = arith.constant 0 : index
    %c0_0 = arith.constant 0 : index
    %0 = vector.load %arg1[%c0, %c0_0] : memref<16x128xf32, #tpu.memory_space<vmem>>, vector<16x128xf32>
    %cst = arith.constant 0.000000e+00 : f32
    %1 = vector.broadcast %cst : f32 to vector<16x128xf32>
    %2 = arith.subf %1, %0 : vector<16x128xf32>
    %3 = math.exp %2 : vector<16x128xf32>
    %cst_1 = arith.constant 1.000000e+00 : f32
    %4 = vector.broadcast %cst_1 : f32 to vector<16x128xf32>
    %5 = arith.addf %4, %3 : vector<16x128xf32>
    %6 = tpu.reciprocal %5 {approx = true} : vector<16x128xf32> -> vector<16x128xf32>
    %7 = arith.mulf %0, %6 : vector<16x128xf32>
    %cst_2 = arith.constant -2.200000e+00 : f32
    %8 = vector.broadcast %cst_2 : f32 to vector<16x128xf32>
    %9 = arith.cmpf oge, %0, %8 : vector<16x128xf32>
    %cst_3 = arith.constant -1.800000e+00 : f32
    %10 = vector.broadcast %cst_3 : f32 to vector<16x128xf32>
    %11 = arith.cmpf olt, %0, %10 : vector<16x128xf32>
    %12 = arith.andi %9, %11 : vector<16x128xi1>
    %cst_4 = arith.constant -1.800000e+00 : f32
    %13 = vector.broadcast %cst_4 : f32 to vector<16x128xf32>
    %14 = arith.cmpf oge, %0, %13 : vector<16x128xf32>
    %cst_5 = arith.constant -1.400000e+00 : f32
    %15 = vector.broadcast %cst_5 : f32 to vector<16x128xf32>
    %16 = arith.cmpf olt, %0, %15 : vector<16x128xf32>
    %17 = arith.andi %14, %16 : vector<16x128xi1>
    %cst_6 = arith.constant -1.400000e+00 : f32
    %18 = vector.broadcast %cst_6 : f32 to vector<16x128xf32>
    %19 = arith.cmpf oge, %0, %18 : vector<16x128xf32>
    %cst_7 = arith.constant -1.000000e+00 : f32
    %20 = vector.broadcast %cst_7 : f32 to vector<16x128xf32>
    %21 = arith.cmpf olt, %0, %20 : vector<16x128xf32>
    %22 = arith.andi %19, %21 : vector<16x128xi1>
    %cst_8 = arith.constant -1.000000e+00 : f32
    %23 = vector.broadcast %cst_8 : f32 to vector<16x128xf32>
    %24 = arith.cmpf oge, %0, %23 : vector<16x128xf32>
    %cst_9 = arith.constant -6.000000e-01 : f32
    %25 = vector.broadcast %cst_9 : f32 to vector<16x128xf32>
    %26 = arith.cmpf olt, %0, %25 : vector<16x128xf32>
    %27 = arith.andi %24, %26 : vector<16x128xi1>
    %cst_10 = arith.constant -6.000000e-01 : f32
    %28 = vector.broadcast %cst_10 : f32 to vector<16x128xf32>
    %29 = arith.cmpf oge, %0, %28 : vector<16x128xf32>
    %cst_11 = arith.constant -2.000000e-01 : f32
    %30 = vector.broadcast %cst_11 : f32 to vector<16x128xf32>
    %31 = arith.cmpf olt, %0, %30 : vector<16x128xf32>
    %32 = arith.andi %29, %31 : vector<16x128xi1>
    %cst_12 = arith.constant -2.000000e-01 : f32
    %33 = vector.broadcast %cst_12 : f32 to vector<16x128xf32>
    %34 = arith.cmpf oge, %0, %33 : vector<16x128xf32>
    %cst_13 = arith.constant 2.000000e-01 : f32
    %35 = vector.broadcast %cst_13 : f32 to vector<16x128xf32>
    %36 = arith.cmpf olt, %0, %35 : vector<16x128xf32>
    %37 = arith.andi %34, %36 : vector<16x128xi1>
    %cst_14 = arith.constant 2.000000e-01 : f32
    %38 = vector.broadcast %cst_14 : f32 to vector<16x128xf32>
    %39 = arith.cmpf oge, %0, %38 : vector<16x128xf32>
    %cst_15 = arith.constant 6.000000e-01 : f32
    %40 = vector.broadcast %cst_15 : f32 to vector<16x128xf32>
    %41 = arith.cmpf olt, %0, %40 : vector<16x128xf32>
    %42 = arith.andi %39, %41 : vector<16x128xi1>
    %cst_16 = arith.constant 6.000000e-01 : f32
    %43 = vector.broadcast %cst_16 : f32 to vector<16x128xf32>
    %44 = arith.cmpf oge, %0, %43 : vector<16x128xf32>
    %cst_17 = arith.constant 1.000000e+00 : f32
    %45 = vector.broadcast %cst_17 : f32 to vector<16x128xf32>
    %46 = arith.cmpf olt, %0, %45 : vector<16x128xf32>
    %47 = arith.andi %44, %46 : vector<16x128xi1>
    %cst_18 = arith.constant 1.000000e+00 : f32
    %48 = vector.broadcast %cst_18 : f32 to vector<16x128xf32>
    %49 = arith.cmpf oge, %0, %48 : vector<16x128xf32>
    %cst_19 = arith.constant 1.400000e+00 : f32
    %50 = vector.broadcast %cst_19 : f32 to vector<16x128xf32>
    %51 = arith.cmpf olt, %0, %50 : vector<16x128xf32>
    %52 = arith.andi %49, %51 : vector<16x128xi1>
    %cst_20 = arith.constant 1.400000e+00 : f32
    %53 = vector.broadcast %cst_20 : f32 to vector<16x128xf32>
    %54 = arith.cmpf oge, %0, %53 : vector<16x128xf32>
    %cst_21 = arith.constant 1.800000e+00 : f32
    %55 = vector.broadcast %cst_21 : f32 to vector<16x128xf32>
    %56 = arith.cmpf olt, %0, %55 : vector<16x128xf32>
    %57 = arith.andi %54, %56 : vector<16x128xi1>
    %cst_22 = arith.constant 1.800000e+00 : f32
    %58 = vector.broadcast %cst_22 : f32 to vector<16x128xf32>
    %59 = arith.cmpf oge, %0, %58 : vector<16x128xf32>
    %cst_23 = arith.constant 2.200000e+00 : f32
    %60 = vector.broadcast %cst_23 : f32 to vector<16x128xf32>
    %61 = arith.cmpf olt, %0, %60 : vector<16x128xf32>
    %62 = arith.andi %59, %61 : vector<16x128xi1>
    %cst_24 = arith.constant -2.200000e+00 : f32
    %63 = vector.broadcast %cst_24 : f32 to vector<16x128xf32>
    %64 = arith.subf %0, %63 : vector<16x128xf32>
    %cst_25 = arith.constant 2.49999952 : f32
    %65 = vector.broadcast %cst_25 : f32 to vector<16x128xf32>
    %66 = arith.mulf %64, %65 : vector<16x128xf32>
    %cst_26 = arith.constant 0.000000e+00 : f32
    %67 = vector.broadcast %cst_26 : f32 to vector<16x128xf32>
    %68 = arith.select %12, %66, %67 : vector<16x128xi1>, vector<16x128xf32>
    %cst_27 = arith.constant -1.400000e+00 : f32
    %69 = vector.broadcast %cst_27 : f32 to vector<16x128xf32>
    %70 = arith.subf %69, %0 : vector<16x128xf32>
    %cst_28 = arith.constant 2.50000024 : f32
    %71 = vector.broadcast %cst_28 : f32 to vector<16x128xf32>
    %72 = arith.mulf %70, %71 : vector<16x128xf32>
    %cst_29 = arith.constant 0.000000e+00 : f32
    %73 = vector.broadcast %cst_29 : f32 to vector<16x128xf32>
    %74 = arith.select %17, %72, %73 : vector<16x128xi1>, vector<16x128xf32>
    %75 = arith.addf %68, %74 : vector<16x128xf32>
    %cst_30 = arith.constant -1.800000e+00 : f32
    %76 = vector.broadcast %cst_30 : f32 to vector<16x128xf32>
    %77 = arith.subf %0, %76 : vector<16x128xf32>
    %cst_31 = arith.constant 2.50000024 : f32
    %78 = vector.broadcast %cst_31 : f32 to vector<16x128xf32>
    %79 = arith.mulf %77, %78 : vector<16x128xf32>
    %cst_32 = arith.constant 0.000000e+00 : f32
    %80 = vector.broadcast %cst_32 : f32 to vector<16x128xf32>
    %81 = arith.select %17, %79, %80 : vector<16x128xi1>, vector<16x128xf32>
    %cst_33 = arith.constant -1.000000e+00 : f32
    %82 = vector.broadcast %cst_33 : f32 to vector<16x128xf32>
    %83 = arith.subf %82, %0 : vector<16x128xf32>
    %cst_34 = arith.constant 2.50000024 : f32
    %84 = vector.broadcast %cst_34 : f32 to vector<16x128xf32>
    %85 = arith.mulf %83, %84 : vector<16x128xf32>
    %cst_35 = arith.constant 0.000000e+00 : f32
    %86 = vector.broadcast %cst_35 : f32 to vector<16x128xf32>
    %87 = arith.select %22, %85, %86 : vector<16x128xi1>, vector<16x128xf32>
    %88 = arith.addf %81, %87 : vector<16x128xf32>
    %cst_36 = arith.constant -1.400000e+00 : f32
    %89 = vector.broadcast %cst_36 : f32 to vector<16x128xf32>
    %90 = arith.subf %0, %89 : vector<16x128xf32>
    %cst_37 = arith.constant 2.50000024 : f32
    %91 = vector.broadcast %cst_37 : f32 to vector<16x128xf32>
    %92 = arith.mulf %90, %91 : vector<16x128xf32>
    %cst_38 = arith.constant 0.000000e+00 : f32
    %93 = vector.broadcast %cst_38 : f32 to vector<16x128xf32>
    %94 = arith.select %22, %92, %93 : vector<16x128xi1>, vector<16x128xf32>
    %cst_39 = arith.constant -6.000000e-01 : f32
    %95 = vector.broadcast %cst_39 : f32 to vector<16x128xf32>
    %96 = arith.subf %95, %0 : vector<16x128xf32>
    %cst_40 = arith.constant 2.50000024 : f32
    %97 = vector.broadcast %cst_40 : f32 to vector<16x128xf32>
    %98 = arith.mulf %96, %97 : vector<16x128xf32>
    %cst_41 = arith.constant 0.000000e+00 : f32
    %99 = vector.broadcast %cst_41 : f32 to vector<16x128xf32>
    %100 = arith.select %27, %98, %99 : vector<16x128xi1>, vector<16x128xf32>
    %101 = arith.addf %94, %100 : vector<16x128xf32>
    %cst_42 = arith.constant -1.000000e+00 : f32
    %102 = vector.broadcast %cst_42 : f32 to vector<16x128xf32>
    %103 = arith.subf %0, %102 : vector<16x128xf32>
    %cst_43 = arith.constant 2.50000024 : f32
    %104 = vector.broadcast %cst_43 : f32 to vector<16x128xf32>
    %105 = arith.mulf %103, %104 : vector<16x128xf32>
    %cst_44 = arith.constant 0.000000e+00 : f32
    %106 = vector.broadcast %cst_44 : f32 to vector<16x128xf32>
    %107 = arith.select %27, %105, %106 : vector<16x128xi1>, vector<16x128xf32>
    %cst_45 = arith.constant -2.000000e-01 : f32
    %108 = vector.broadcast %cst_45 : f32 to vector<16x128xf32>
    %109 = arith.subf %108, %0 : vector<16x128xf32>
    %cst_46 = arith.constant 2.49999976 : f32
    %110 = vector.broadcast %cst_46 : f32 to vector<16x128xf32>
    %111 = arith.mulf %109, %110 : vector<16x128xf32>
    %cst_47 = arith.constant 0.000000e+00 : f32
    %112 = vector.broadcast %cst_47 : f32 to vector<16x128xf32>
    %113 = arith.select %32, %111, %112 : vector<16x128xi1>, vector<16x128xf32>
    %114 = arith.addf %107, %113 : vector<16x128xf32>
    %cst_48 = arith.constant -6.000000e-01 : f32
    %115 = vector.broadcast %cst_48 : f32 to vector<16x128xf32>
    %116 = arith.subf %0, %115 : vector<16x128xf32>
    %cst_49 = arith.constant 2.49999976 : f32
    %117 = vector.broadcast %cst_49 : f32 to vector<16x128xf32>
    %118 = arith.mulf %116, %117 : vector<16x128xf32>
    %cst_50 = arith.constant 0.000000e+00 : f32
    %119 = vector.broadcast %cst_50 : f32 to vector<16x128xf32>
    %120 = arith.select %32, %118, %119 : vector<16x128xi1>, vector<16x128xf32>
    %cst_51 = arith.constant 2.000000e-01 : f32
    %121 = vector.broadcast %cst_51 : f32 to vector<16x128xf32>
    %122 = arith.subf %121, %0 : vector<16x128xf32>
    %cst_52 = arith.constant 2.500000e+00 : f32
    %123 = vector.broadcast %cst_52 : f32 to vector<16x128xf32>
    %124 = arith.mulf %122, %123 : vector<16x128xf32>
    %cst_53 = arith.constant 0.000000e+00 : f32
    %125 = vector.broadcast %cst_53 : f32 to vector<16x128xf32>
    %126 = arith.select %37, %124, %125 : vector<16x128xi1>, vector<16x128xf32>
    %127 = arith.addf %120, %126 : vector<16x128xf32>
    %cst_54 = arith.constant -2.000000e-01 : f32
    %128 = vector.broadcast %cst_54 : f32 to vector<16x128xf32>
    %129 = arith.subf %0, %128 : vector<16x128xf32>
    %cst_55 = arith.constant 2.500000e+00 : f32
    %130 = vector.broadcast %cst_55 : f32 to vector<16x128xf32>
    %131 = arith.mulf %129, %130 : vector<16x128xf32>
    %cst_56 = arith.constant 0.000000e+00 : f32
    %132 = vector.broadcast %cst_56 : f32 to vector<16x128xf32>
    %133 = arith.select %37, %131, %132 : vector<16x128xi1>, vector<16x128xf32>
    %cst_57 = arith.constant 6.000000e-01 : f32
    %134 = vector.broadcast %cst_57 : f32 to vector<16x128xf32>
    %135 = arith.subf %134, %0 : vector<16x128xf32>
    %cst_58 = arith.constant 2.49999976 : f32
    %136 = vector.broadcast %cst_58 : f32 to vector<16x128xf32>
    %137 = arith.mulf %135, %136 : vector<16x128xf32>
    %cst_59 = arith.constant 0.000000e+00 : f32
    %138 = vector.broadcast %cst_59 : f32 to vector<16x128xf32>
    %139 = arith.select %42, %137, %138 : vector<16x128xi1>, vector<16x128xf32>
    %140 = arith.addf %133, %139 : vector<16x128xf32>
    %cst_60 = arith.constant 2.000000e-01 : f32
    %141 = vector.broadcast %cst_60 : f32 to vector<16x128xf32>
    %142 = arith.subf %0, %141 : vector<16x128xf32>
    %cst_61 = arith.constant 2.49999976 : f32
    %143 = vector.broadcast %cst_61 : f32 to vector<16x128xf32>
    %144 = arith.mulf %142, %143 : vector<16x128xf32>
    %cst_62 = arith.constant 0.000000e+00 : f32
    %145 = vector.broadcast %cst_62 : f32 to vector<16x128xf32>
    %146 = arith.select %42, %144, %145 : vector<16x128xi1>, vector<16x128xf32>
    %cst_63 = arith.constant 1.000000e+00 : f32
    %147 = vector.broadcast %cst_63 : f32 to vector<16x128xf32>
    %148 = arith.subf %147, %0 : vector<16x128xf32>
    %cst_64 = arith.constant 2.50000024 : f32
    %149 = vector.broadcast %cst_64 : f32 to vector<16x128xf32>
    %150 = arith.mulf %148, %149 : vector<16x128xf32>
    %cst_65 = arith.constant 0.000000e+00 : f32
    %151 = vector.broadcast %cst_65 : f32 to vector<16x128xf32>
    %152 = arith.select %47, %150, %151 : vector<16x128xi1>, vector<16x128xf32>
    %153 = arith.addf %146, %152 : vector<16x128xf32>
    %cst_66 = arith.constant 6.000000e-01 : f32
    %154 = vector.broadcast %cst_66 : f32 to vector<16x128xf32>
    %155 = arith.subf %0, %154 : vector<16x128xf32>
    %cst_67 = arith.constant 2.50000024 : f32
    %156 = vector.broadcast %cst_67 : f32 to vector<16x128xf32>
    %157 = arith.mulf %155, %156 : vector<16x128xf32>
    %cst_68 = arith.constant 0.000000e+00 : f32
    %158 = vector.broadcast %cst_68 : f32 to vector<16x128xf32>
    %159 = arith.select %47, %157, %158 : vector<16x128xi1>, vector<16x128xf32>
    %cst_69 = arith.constant 1.400000e+00 : f32
    %160 = vector.broadcast %cst_69 : f32 to vector<16x128xf32>
    %161 = arith.subf %160, %0 : vector<16x128xf32>
    %cst_70 = arith.constant 2.50000024 : f32
    %162 = vector.broadcast %cst_70 : f32 to vector<16x128xf32>
    %163 = arith.mulf %161, %162 : vector<16x128xf32>
    %cst_71 = arith.constant 0.000000e+00 : f32
    %164 = vector.broadcast %cst_71 : f32 to vector<16x128xf32>
    %165 = arith.select %52, %163, %164 : vector<16x128xi1>, vector<16x128xf32>
    %166 = arith.addf %159, %165 : vector<16x128xf32>
    %cst_72 = arith.constant 1.000000e+00 : f32
    %167 = vector.broadcast %cst_72 : f32 to vector<16x128xf32>
    %168 = arith.subf %0, %167 : vector<16x128xf32>
    %cst_73 = arith.constant 2.50000024 : f32
    %169 = vector.broadcast %cst_73 : f32 to vector<16x128xf32>
    %170 = arith.mulf %168, %169 : vector<16x128xf32>
    %cst_74 = arith.constant 0.000000e+00 : f32
    %171 = vector.broadcast %cst_74 : f32 to vector<16x128xf32>
    %172 = arith.select %52, %170, %171 : vector<16x128xi1>, vector<16x128xf32>
    %cst_75 = arith.constant 1.800000e+00 : f32
    %173 = vector.broadcast %cst_75 : f32 to vector<16x128xf32>
    %174 = arith.subf %173, %0 : vector<16x128xf32>
    %cst_76 = arith.constant 2.50000024 : f32
    %175 = vector.broadcast %cst_76 : f32 to vector<16x128xf32>
    %176 = arith.mulf %174, %175 : vector<16x128xf32>
    %cst_77 = arith.constant 0.000000e+00 : f32
    %177 = vector.broadcast %cst_77 : f32 to vector<16x128xf32>
    %178 = arith.select %57, %176, %177 : vector<16x128xi1>, vector<16x128xf32>
    %179 = arith.addf %172, %178 : vector<16x128xf32>
    %cst_78 = arith.constant 1.400000e+00 : f32
    %180 = vector.broadcast %cst_78 : f32 to vector<16x128xf32>
    %181 = arith.subf %0, %180 : vector<16x128xf32>
    %cst_79 = arith.constant 2.50000024 : f32
    %182 = vector.broadcast %cst_79 : f32 to vector<16x128xf32>
    %183 = arith.mulf %181, %182 : vector<16x128xf32>
    %cst_80 = arith.constant 0.000000e+00 : f32
    %184 = vector.broadcast %cst_80 : f32 to vector<16x128xf32>
    %185 = arith.select %57, %183, %184 : vector<16x128xi1>, vector<16x128xf32>
    %cst_81 = arith.constant 2.200000e+00 : f32
    %186 = vector.broadcast %cst_81 : f32 to vector<16x128xf32>
    %187 = arith.subf %186, %0 : vector<16x128xf32>
    %cst_82 = arith.constant 2.49999952 : f32
    %188 = vector.broadcast %cst_82 : f32 to vector<16x128xf32>
    %189 = arith.mulf %187, %188 : vector<16x128xf32>
    %cst_83 = arith.constant 0.000000e+00 : f32
    %190 = vector.broadcast %cst_83 : f32 to vector<16x128xf32>
    %191 = arith.select %62, %189, %190 : vector<16x128xi1>, vector<16x128xf32>
    %192 = arith.addf %185, %191 : vector<16x128xf32>
    %cst_84 = arith.constant -2.200000e+00 : f32
    %193 = vector.broadcast %cst_84 : f32 to vector<16x128xf32>
    %194 = arith.subf %0, %193 : vector<16x128xf32>
    %cst_85 = arith.constant 1.24999988 : f32
    %195 = vector.broadcast %cst_85 : f32 to vector<16x128xf32>
    %196 = arith.mulf %194, %195 : vector<16x128xf32>
    %197 = arith.mulf %196, %75 : vector<16x128xf32>
    %cst_86 = arith.constant -1.000000e+00 : f32
    %198 = vector.broadcast %cst_86 : f32 to vector<16x128xf32>
    %199 = arith.subf %198, %0 : vector<16x128xf32>
    %cst_87 = arith.constant 1.25000012 : f32
    %200 = vector.broadcast %cst_87 : f32 to vector<16x128xf32>
    %201 = arith.mulf %199, %200 : vector<16x128xf32>
    %202 = arith.mulf %201, %88 : vector<16x128xf32>
    %203 = arith.addf %197, %202 : vector<16x128xf32>
    %cst_88 = arith.constant -1.800000e+00 : f32
    %204 = vector.broadcast %cst_88 : f32 to vector<16x128xf32>
    %205 = arith.subf %0, %204 : vector<16x128xf32>
    %cst_89 = arith.constant 1.25000012 : f32
    %206 = vector.broadcast %cst_89 : f32 to vector<16x128xf32>
    %207 = arith.mulf %205, %206 : vector<16x128xf32>
    %208 = arith.mulf %207, %88 : vector<16x128xf32>
    %cst_90 = arith.constant -6.000000e-01 : f32
    %209 = vector.broadcast %cst_90 : f32 to vector<16x128xf32>
    %210 = arith.subf %209, %0 : vector<16x128xf32>
    %cst_91 = arith.constant 1.25000012 : f32
    %211 = vector.broadcast %cst_91 : f32 to vector<16x128xf32>
    %212 = arith.mulf %210, %211 : vector<16x128xf32>
    %213 = arith.mulf %212, %101 : vector<16x128xf32>
    %214 = arith.addf %208, %213 : vector<16x128xf32>
    %cst_92 = arith.constant -1.400000e+00 : f32
    %215 = vector.broadcast %cst_92 : f32 to vector<16x128xf32>
    %216 = arith.subf %0, %215 : vector<16x128xf32>
    %cst_93 = arith.constant 1.25000012 : f32
    %217 = vector.broadcast %cst_93 : f32 to vector<16x128xf32>
    %218 = arith.mulf %216, %217 : vector<16x128xf32>
    %219 = arith.mulf %218, %101 : vector<16x128xf32>
    %cst_94 = arith.constant -2.000000e-01 : f32
    %220 = vector.broadcast %cst_94 : f32 to vector<16x128xf32>
    %221 = arith.subf %220, %0 : vector<16x128xf32>
    %cst_95 = arith.constant 1.250000e+00 : f32
    %222 = vector.broadcast %cst_95 : f32 to vector<16x128xf32>
    %223 = arith.mulf %221, %222 : vector<16x128xf32>
    %224 = arith.mulf %223, %114 : vector<16x128xf32>
    %225 = arith.addf %219, %224 : vector<16x128xf32>
    %cst_96 = arith.constant -1.000000e+00 : f32
    %226 = vector.broadcast %cst_96 : f32 to vector<16x128xf32>
    %227 = arith.subf %0, %226 : vector<16x128xf32>
    %cst_97 = arith.constant 1.250000e+00 : f32
    %228 = vector.broadcast %cst_97 : f32 to vector<16x128xf32>
    %229 = arith.mulf %227, %228 : vector<16x128xf32>
    %230 = arith.mulf %229, %114 : vector<16x128xf32>
    %cst_98 = arith.constant 2.000000e-01 : f32
    %231 = vector.broadcast %cst_98 : f32 to vector<16x128xf32>
    %232 = arith.subf %231, %0 : vector<16x128xf32>
    %cst_99 = arith.constant 1.250000e+00 : f32
    %233 = vector.broadcast %cst_99 : f32 to vector<16x128xf32>
    %234 = arith.mulf %232, %233 : vector<16x128xf32>
    %235 = arith.mulf %234, %127 : vector<16x128xf32>
    %236 = arith.addf %230, %235 : vector<16x128xf32>
    %cst_100 = arith.constant -6.000000e-01 : f32
    %237 = vector.broadcast %cst_100 : f32 to vector<16x128xf32>
    %238 = arith.subf %0, %237 : vector<16x128xf32>
    %cst_101 = arith.constant 1.250000e+00 : f32
    %239 = vector.broadcast %cst_101 : f32 to vector<16x128xf32>
    %240 = arith.mulf %238, %239 : vector<16x128xf32>
    %241 = arith.mulf %240, %127 : vector<16x128xf32>
    %cst_102 = arith.constant 6.000000e-01 : f32
    %242 = vector.broadcast %cst_102 : f32 to vector<16x128xf32>
    %243 = arith.subf %242, %0 : vector<16x128xf32>
    %cst_103 = arith.constant 1.250000e+00 : f32
    %244 = vector.broadcast %cst_103 : f32 to vector<16x128xf32>
    %245 = arith.mulf %243, %244 : vector<16x128xf32>
    %246 = arith.mulf %245, %140 : vector<16x128xf32>
    %247 = arith.addf %241, %246 : vector<16x128xf32>
    %cst_104 = arith.constant -2.000000e-01 : f32
    %248 = vector.broadcast %cst_104 : f32 to vector<16x128xf32>
    %249 = arith.subf %0, %248 : vector<16x128xf32>
    %cst_105 = arith.constant 1.250000e+00 : f32
    %250 = vector.broadcast %cst_105 : f32 to vector<16x128xf32>
    %251 = arith.mulf %249, %250 : vector<16x128xf32>
    %252 = arith.mulf %251, %140 : vector<16x128xf32>
    %cst_106 = arith.constant 1.000000e+00 : f32
    %253 = vector.broadcast %cst_106 : f32 to vector<16x128xf32>
    %254 = arith.subf %253, %0 : vector<16x128xf32>
    %cst_107 = arith.constant 1.250000e+00 : f32
    %255 = vector.broadcast %cst_107 : f32 to vector<16x128xf32>
    %256 = arith.mulf %254, %255 : vector<16x128xf32>
    %257 = arith.mulf %256, %153 : vector<16x128xf32>
    %258 = arith.addf %252, %257 : vector<16x128xf32>
    %cst_108 = arith.constant 2.000000e-01 : f32
    %259 = vector.broadcast %cst_108 : f32 to vector<16x128xf32>
    %260 = arith.subf %0, %259 : vector<16x128xf32>
    %cst_109 = arith.constant 1.250000e+00 : f32
    %261 = vector.broadcast %cst_109 : f32 to vector<16x128xf32>
    %262 = arith.mulf %260, %261 : vector<16x128xf32>
    %263 = arith.mulf %262, %153 : vector<16x128xf32>
    %cst_110 = arith.constant 1.400000e+00 : f32
    %264 = vector.broadcast %cst_110 : f32 to vector<16x128xf32>
    %265 = arith.subf %264, %0 : vector<16x128xf32>
    %cst_111 = arith.constant 1.25000012 : f32
    %266 = vector.broadcast %cst_111 : f32 to vector<16x128xf32>
    %267 = arith.mulf %265, %266 : vector<16x128xf32>
    %268 = arith.mulf %267, %166 : vector<16x128xf32>
    %269 = arith.addf %263, %268 : vector<16x128xf32>
    %cst_112 = arith.constant 6.000000e-01 : f32
    %270 = vector.broadcast %cst_112 : f32 to vector<16x128xf32>
    %271 = arith.subf %0, %270 : vector<16x128xf32>
    %cst_113 = arith.constant 1.25000012 : f32
    %272 = vector.broadcast %cst_113 : f32 to vector<16x128xf32>
    %273 = arith.mulf %271, %272 : vector<16x128xf32>
    %274 = arith.mulf %273, %166 : vector<16x128xf32>
    %cst_114 = arith.constant 1.800000e+00 : f32
    %275 = vector.broadcast %cst_114 : f32 to vector<16x128xf32>
    %276 = arith.subf %275, %0 : vector<16x128xf32>
    %cst_115 = arith.constant 1.25000012 : f32
    %277 = vector.broadcast %cst_115 : f32 to vector<16x128xf32>
    %278 = arith.mulf %276, %277 : vector<16x128xf32>
    %279 = arith.mulf %278, %179 : vector<16x128xf32>
    %280 = arith.addf %274, %279 : vector<16x128xf32>
    %cst_116 = arith.constant 1.000000e+00 : f32
    %281 = vector.broadcast %cst_116 : f32 to vector<16x128xf32>
    %282 = arith.subf %0, %281 : vector<16x128xf32>
    %cst_117 = arith.constant 1.25000012 : f32
    %283 = vector.broadcast %cst_117 : f32 to vector<16x128xf32>
    %284 = arith.mulf %282, %283 : vector<16x128xf32>
    %285 = arith.mulf %284, %179 : vector<16x128xf32>
    %cst_118 = arith.constant 2.200000e+00 : f32
    %286 = vector.broadcast %cst_118 : f32 to vector<16x128xf32>
    %287 = arith.subf %286, %0 : vector<16x128xf32>
    %cst_119 = arith.constant 1.24999988 : f32
    %288 = vector.broadcast %cst_119 : f32 to vector<16x128xf32>
    %289 = arith.mulf %287, %288 : vector<16x128xf32>
    %290 = arith.mulf %289, %192 : vector<16x128xf32>
    %291 = arith.addf %285, %290 : vector<16x128xf32>
    %cst_120 = arith.constant -2.200000e+00 : f32
    %292 = vector.broadcast %cst_120 : f32 to vector<16x128xf32>
    %293 = arith.subf %0, %292 : vector<16x128xf32>
    %cst_121 = arith.constant 0.833333313 : f32
    %294 = vector.broadcast %cst_121 : f32 to vector<16x128xf32>
    %295 = arith.mulf %293, %294 : vector<16x128xf32>
    %296 = arith.mulf %295, %203 : vector<16x128xf32>
    %cst_122 = arith.constant -6.000000e-01 : f32
    %297 = vector.broadcast %cst_122 : f32 to vector<16x128xf32>
    %298 = arith.subf %297, %0 : vector<16x128xf32>
    %cst_123 = arith.constant 0.833333373 : f32
    %299 = vector.broadcast %cst_123 : f32 to vector<16x128xf32>
    %300 = arith.mulf %298, %299 : vector<16x128xf32>
    %301 = arith.mulf %300, %214 : vector<16x128xf32>
    %302 = arith.addf %296, %301 : vector<16x128xf32>
    %cst_124 = arith.constant -1.800000e+00 : f32
    %303 = vector.broadcast %cst_124 : f32 to vector<16x128xf32>
    %304 = arith.subf %0, %303 : vector<16x128xf32>
    %cst_125 = arith.constant 0.833333373 : f32
    %305 = vector.broadcast %cst_125 : f32 to vector<16x128xf32>
    %306 = arith.mulf %304, %305 : vector<16x128xf32>
    %307 = arith.mulf %306, %214 : vector<16x128xf32>
    %cst_126 = arith.constant -2.000000e-01 : f32
    %308 = vector.broadcast %cst_126 : f32 to vector<16x128xf32>
    %309 = arith.subf %308, %0 : vector<16x128xf32>
    %cst_127 = arith.constant 0.833333373 : f32
    %310 = vector.broadcast %cst_127 : f32 to vector<16x128xf32>
    %311 = arith.mulf %309, %310 : vector<16x128xf32>
    %312 = arith.mulf %311, %225 : vector<16x128xf32>
    %313 = arith.addf %307, %312 : vector<16x128xf32>
    %cst_128 = arith.constant -1.400000e+00 : f32
    %314 = vector.broadcast %cst_128 : f32 to vector<16x128xf32>
    %315 = arith.subf %0, %314 : vector<16x128xf32>
    %cst_129 = arith.constant 0.833333373 : f32
    %316 = vector.broadcast %cst_129 : f32 to vector<16x128xf32>
    %317 = arith.mulf %315, %316 : vector<16x128xf32>
    %318 = arith.mulf %317, %225 : vector<16x128xf32>
    %cst_130 = arith.constant 2.000000e-01 : f32
    %319 = vector.broadcast %cst_130 : f32 to vector<16x128xf32>
    %320 = arith.subf %319, %0 : vector<16x128xf32>
    %cst_131 = arith.constant 0.833333313 : f32
    %321 = vector.broadcast %cst_131 : f32 to vector<16x128xf32>
    %322 = arith.mulf %320, %321 : vector<16x128xf32>
    %323 = arith.mulf %322, %236 : vector<16x128xf32>
    %324 = arith.addf %318, %323 : vector<16x128xf32>
    %cst_132 = arith.constant -1.000000e+00 : f32
    %325 = vector.broadcast %cst_132 : f32 to vector<16x128xf32>
    %326 = arith.subf %0, %325 : vector<16x128xf32>
    %cst_133 = arith.constant 0.833333313 : f32
    %327 = vector.broadcast %cst_133 : f32 to vector<16x128xf32>
    %328 = arith.mulf %326, %327 : vector<16x128xf32>
    %329 = arith.mulf %328, %236 : vector<16x128xf32>
    %cst_134 = arith.constant 6.000000e-01 : f32
    %330 = vector.broadcast %cst_134 : f32 to vector<16x128xf32>
    %331 = arith.subf %330, %0 : vector<16x128xf32>
    %cst_135 = arith.constant 0.833333313 : f32
    %332 = vector.broadcast %cst_135 : f32 to vector<16x128xf32>
    %333 = arith.mulf %331, %332 : vector<16x128xf32>
    %334 = arith.mulf %333, %247 : vector<16x128xf32>
    %335 = arith.addf %329, %334 : vector<16x128xf32>
    %cst_136 = arith.constant -6.000000e-01 : f32
    %336 = vector.broadcast %cst_136 : f32 to vector<16x128xf32>
    %337 = arith.subf %0, %336 : vector<16x128xf32>
    %cst_137 = arith.constant 0.833333313 : f32
    %338 = vector.broadcast %cst_137 : f32 to vector<16x128xf32>
    %339 = arith.mulf %337, %338 : vector<16x128xf32>
    %340 = arith.mulf %339, %247 : vector<16x128xf32>
    %cst_138 = arith.constant 1.000000e+00 : f32
    %341 = vector.broadcast %cst_138 : f32 to vector<16x128xf32>
    %342 = arith.subf %341, %0 : vector<16x128xf32>
    %cst_139 = arith.constant 0.833333313 : f32
    %343 = vector.broadcast %cst_139 : f32 to vector<16x128xf32>
    %344 = arith.mulf %342, %343 : vector<16x128xf32>
    %345 = arith.mulf %344, %258 : vector<16x128xf32>
    %346 = arith.addf %340, %345 : vector<16x128xf32>
    %cst_140 = arith.constant -2.000000e-01 : f32
    %347 = vector.broadcast %cst_140 : f32 to vector<16x128xf32>
    %348 = arith.subf %0, %347 : vector<16x128xf32>
    %cst_141 = arith.constant 0.833333313 : f32
    %349 = vector.broadcast %cst_141 : f32 to vector<16x128xf32>
    %350 = arith.mulf %348, %349 : vector<16x128xf32>
    %351 = arith.mulf %350, %258 : vector<16x128xf32>
    %cst_142 = arith.constant 1.400000e+00 : f32
    %352 = vector.broadcast %cst_142 : f32 to vector<16x128xf32>
    %353 = arith.subf %352, %0 : vector<16x128xf32>
    %cst_143 = arith.constant 0.833333373 : f32
    %354 = vector.broadcast %cst_143 : f32 to vector<16x128xf32>
    %355 = arith.mulf %353, %354 : vector<16x128xf32>
    %356 = arith.mulf %355, %269 : vector<16x128xf32>
    %357 = arith.addf %351, %356 : vector<16x128xf32>
    %cst_144 = arith.constant 2.000000e-01 : f32
    %358 = vector.broadcast %cst_144 : f32 to vector<16x128xf32>
    %359 = arith.subf %0, %358 : vector<16x128xf32>
    %cst_145 = arith.constant 0.833333373 : f32
    %360 = vector.broadcast %cst_145 : f32 to vector<16x128xf32>
    %361 = arith.mulf %359, %360 : vector<16x128xf32>
    %362 = arith.mulf %361, %269 : vector<16x128xf32>
    %cst_146 = arith.constant 1.800000e+00 : f32
    %363 = vector.broadcast %cst_146 : f32 to vector<16x128xf32>
    %364 = arith.subf %363, %0 : vector<16x128xf32>
    %cst_147 = arith.constant 0.833333373 : f32
    %365 = vector.broadcast %cst_147 : f32 to vector<16x128xf32>
    %366 = arith.mulf %364, %365 : vector<16x128xf32>
    %367 = arith.mulf %366, %280 : vector<16x128xf32>
    %368 = arith.addf %362, %367 : vector<16x128xf32>
    %cst_148 = arith.constant 6.000000e-01 : f32
    %369 = vector.broadcast %cst_148 : f32 to vector<16x128xf32>
    %370 = arith.subf %0, %369 : vector<16x128xf32>
    %cst_149 = arith.constant 0.833333373 : f32
    %371 = vector.broadcast %cst_149 : f32 to vector<16x128xf32>
    %372 = arith.mulf %370, %371 : vector<16x128xf32>
    %373 = arith.mulf %372, %280 : vector<16x128xf32>
    %cst_150 = arith.constant 2.200000e+00 : f32
    %374 = vector.broadcast %cst_150 : f32 to vector<16x128xf32>
    %375 = arith.subf %374, %0 : vector<16x128xf32>
    %cst_151 = arith.constant 0.833333313 : f32
    %376 = vector.broadcast %cst_151 : f32 to vector<16x128xf32>
    %377 = arith.mulf %375, %376 : vector<16x128xf32>
    %378 = arith.mulf %377, %291 : vector<16x128xf32>
    %379 = arith.addf %373, %378 : vector<16x128xf32>
    %380 = tpu.concatenate %7, %302, %313, %324, %335, %346, %357, %368, %379 in 0 : vector<16x128xf32>, vector<16x128xf32>, vector<16x128xf32>, vector<16x128xf32>, vector<16x128xf32>, vector<16x128xf32>, vector<16x128xf32>, vector<16x128xf32>, vector<16x128xf32> -> vector<144x128xf32>
    %381 = arith.truncf %380 : vector<144x128xf32> to vector<144x128xbf16>
    %c0_152 = arith.constant 0 : index
    %c0_153 = arith.constant 0 : index
    %382 = vector.load %arg2[%c0_152, %c0_153] : memref<16x144xbf16, #tpu.memory_space<vmem>>, vector<16x144xbf16>
    %cst_154 = arith.constant dense<0.000000e+00> : vector<16x128xf32>
    %383 = tpu.matmul %382, %381, %cst_154 {dimension_numbers = #tpu.dot_dimension_numbers<[1], [0], [0], [1], [0, 0, 1, 1], [], []>} : vector<16x144xbf16>, vector<144x128xbf16>, vector<16x128xf32> -> vector<16x128xf32>
    %c0_155 = arith.constant 0 : index
    %c0_156 = arith.constant 0 : index
    %384 = vector.load %arg3[%c0_155, %c0_156] : memref<16x128xf32, #tpu.memory_space<vmem>>, vector<16x128xf32>
    tpu.vector_store %arg3[%c0_155, %c0_156], %383 {strides = array<i32>} : memref<16x128xf32, #tpu.memory_space<vmem>>, vector<16x128xf32>,
    return
  }
  func.func @transform_0(%arg0: i32) -> (i32, i32) {
    %c0_i32 = arith.constant 0 : i32
    %c0_i32_0 = arith.constant 0 : i32
    return %c0_i32, %arg0 : i32, i32
  }
  func.func @transform_1(%arg0: i32) -> (i32, i32) {
    %c0_i32 = arith.constant 0 : i32
    %c0_i32_0 = arith.constant 0 : i32
    %c0_i32_1 = arith.constant 0 : i32
    return %c0_i32, %c0_i32_0 : i32, i32
  }
  func.func @transform_2(%arg0: i32) -> (i32, i32) {
    %c0_i32 = arith.constant 0 : i32
    %c0_i32_0 = arith.constant 0 : i32
    return %c0_i32, %arg0 : i32, i32
  }
}

</mosaic_0001>

<bundles_post_ra>
// kernel: tpu_custom_call.1
= control target key start
LH: loop header
LB: loop body
LE: loop exit
PB: predicated region body
PF: predicated region fallthrough
CT: control target
= control target key end

     0   :  { %7 = vsyncpa [#allocation3], 0  ;;  %s1093_s0 = inlined_call_operand.hbm [shape: f32[16,128], index: 0, kind: input, shape index: {}]   ;;  %s1094_s1 = inlined_call_operand.hbm [shape: bf16[16,144], index: 1, kind: input, shape index: {}]   ;;  %s1095_s2 = inlined_call_operand.hbm [shape: f32[16,128], index: 2, kind: output, shape index: {}]  }
   0x1   :  { %8 = vsyncpa [#allocation6], 0 }
   0x2   :  { %9 = vsyncpa [#allocation4], 0  ;;  %s622_s9 = smov [#allocation2]  }
   0x3   :  { %s15_s10 = sshll.u32 %s622_s9, 4  ;;  %s16_s10 = int_to_ptr.vmem [resolvable:$true] %s15_s10 }
   0x4   :  { %s564_s11 = scalar_lea.vmem %s16_s10, 256  ;;  %p569_p1 = scmp.lt.s32.totalorder %s16_s10, %s16_s10 }
   0x5   :  { %p565_p0 = scmp.ne.s32.totalorder %s16_s10, %s564_s11  ;;  %p570_p2 = scmp.lt.s32.totalorder %s564_s11, %s564_s11 }
   0x7   :  { %p571_p3 = por %p570_p2, %p569_p1 }
   0x9   :  { %p572_p4 = pnand %p571_p3, %p565_p0 }
   0xb   :  { %575 = shalt.err (!%p572_p4)
}
   0xc   :  { %s623_s12 = smov 128   ;;  %s624_s13 = smov 8  }
   0xd   :  { %21 = dma.hbm_to_vmem [thread:$0]  %s1093_s0, 256, %s16_s10, [#allocation3], %s623_s12, %s623_s12, %s624_s13  }
   0xe   :  { %s625_s16 = smov [#allocation5]  }
   0xf   :  { %s27_s17 = sshll.u32 %s625_s16, 4  ;;  %s28_s17 = int_to_ptr.vmem [resolvable:$true] %s27_s17 }
  0x10   :  { %s584_s18 = scalar_lea.vmem %s28_s17, 256  ;;  %p589_p6 = scmp.lt.s32.totalorder %s28_s17, %s28_s17 }
  0x11   :  { %p585_p5 = scmp.ne.s32.totalorder %s28_s17, %s584_s18  ;;  %p590_p7 = scmp.lt.s32.totalorder %s584_s18, %s584_s18 }
  0x13   :  { %p591_p8 = por %p590_p7, %p589_p6 }
  0x15   :  { %p592_p9 = pnand %p591_p8, %p585_p5 }
  0x17   :  { %595 = shalt.err (!%p592_p9)
}
  0x18   :  { %33 = dma.hbm_to_vmem [thread:$0]  %s1094_s1, 256, %s28_s17, [#allocation6], %s623_s12, %s623_s12, %s624_s13  }
  0x19   :  { %616 = dma.done.wait [#allocation3], 256  }
  0x1a   :  { %617 = vsyncadd [#allocation3], 4294967040 }
  0x1b   :  { %618 = dma.done.wait [#allocation6], 256  }
  0x1c   :  { %619 = vsyncadd [#allocation6], 4294967040  ;;  %v626_v0 = vmov 0   ;;  %v656_v1 = vld [vmem:[#allocation2] sm:$0xff]  ;;  %v658_v2 = vld [vmem:[#allocation2 + $0x8] sm:$0xff]  ;;  %s627_s0 = smov [#allocation7]  }
  0x1d   :  { %455 = vmatprep.subr.bf16.mxu0 %v626_v0  ;;  %vm91_vm0 = vcmp.ge.f32.partialorder %v656_v1, 0.2  ;;  %vm92_vm1 = vcmp.ge.f32.partialorder %v658_v2, 0.2  ;;  %vm93_vm2 = vcmp.lt.f32.partialorder %v656_v1, 0.6 }
  0x1e   :  { %vm94_vm3 = vcmp.lt.f32.partialorder %v658_v2, 0.6  ;;  %vm97_vm4 = vcmp.ge.f32.partialorder %v656_v1, 0.6  ;;  %vm98_vm5 = vcmp.ge.f32.partialorder %v658_v2, 0.6  ;;  %vm672_vm12 = vmand %vm91_vm0, %vm93_vm2 }
  0x1f   :  { %vm99_vm6 = vcmp.lt.f32.partialorder %v656_v1, 1.0  ;;  %vm100_vm7 = vcmp.lt.f32.partialorder %v658_v2, 1.0  ;;  %vm103_vm8 = vcmp.ge.f32.partialorder %v656_v1, 1.0  ;;  %vm105_vm9 = vcmp.lt.f32.partialorder %v656_v1, 1.4  ;;  %vm688_vm14 = vmand %vm92_vm1, %vm94_vm3  ;;  %s503_s1 = sshll.u32 %s627_s0, 4  ;;  %s504_s1 = int_to_ptr.vmem [resolvable:$true] %s503_s1 }
  0x20   :  { %vm106_vm10 = vcmp.lt.f32.partialorder %v658_v2, 1.4  ;;  %vm109_vm11 = vcmp.ge.f32.partialorder %v656_v1, 1.4  ;;  %vm110_vm13 = vcmp.ge.f32.partialorder %v658_v2, 1.4  ;;  %vm708_vm15 = vmand %vm97_vm4, %vm99_vm6  ;;  %p601_p11 = scmp.lt.s32.totalorder %s504_s1, %s504_s1 }
  0x21   :  { %v678_v4 = vsub.f32 0.6, %v656_v1  ;;  %v681_v5 = vsub.f32 0.6, %v658_v2  ;;  %v684_v6 = vadd.f32 -0.2, %v656_v1  ;;  %vm719_vm3 = vmand %vm98_vm5, %vm100_vm7 }
  0x22   :  { %v693_v8 = vadd.f32 -0.2, %v658_v2  ;;  %v696_v9 = vsub.f32 1.0, %v656_v1  ;;  %v699_v10 = vsub.f32 1.0, %v658_v2  ;;  %v702_v11 = vadd.f32 -0.6, %v656_v1  ;;  %vm755_vm5 = vmand %vm103_vm8, %vm105_vm9 }
  0x23   :  { %vm111_vm0 = vcmp.lt.f32.partialorder %v656_v1, 1.8  ;;  %vm112_vm1 = vcmp.lt.f32.partialorder %v658_v2, 1.8  ;;  %v207_v13 = vmul.f32 2.4999998, %v684_v6 }
  0x24   :  { %vm451_vm2 = vcmask 130048   ;;  %v208_v15 = vmul.f32 2.4999998, %v693_v8  ;;  %v213_v16 = vmul.f32 2.5000002, %v696_v9  ;;  %vm104_vm4 = vcmp.ge.f32.partialorder %v658_v2, 1.0  ;;  %vm787_vm7 = vmand %vm109_vm11, %vm111_vm0 }
  0x25   :  { %v214_v17 = vmul.f32 2.5000002, %v699_v10  ;;  %v728_v18 = vmul.f32 2.4999998, %v678_v4  ;;  %v209_v19 = vsel %vm672_vm12, %v207_v13, 0.0  ;;  %v765_v32 = vadd.f32 -1.0, %v656_v1  ;;  %vm774_vm6 = vmand %vm104_vm4, %vm106_vm10 }
  0x26   :  { %v733_v20 = vadd.f32 -0.6, %v658_v2  ;;  %v736_v21 = vmul.f32 2.4999998, %v681_v5  ;;  %v210_v22 = vsel %vm688_vm14, %v208_v15, 0.0  ;;  %v215_v23 = vsel %vm708_vm15, %v213_v16, 0.0  ;;  %vm804_vm8 = vmand %vm110_vm13, %vm112_vm1 }
  0x27   :  { %v221_v24 = vmul.f32 2.5000002, %v702_v11  ;;  %v216_v25 = vsel %vm719_vm3, %v214_v17, 0.0  ;;  %v745_v26 = vadd.f32 %v215_v23, %v209_v19  ;;  %v749_v28 = vsub.f32 1.4, %v656_v1  ;;  %s596_s21 = scalar_lea.vmem %s504_s1, 256 }
  0x28   :  { %v222_v27 = vmul.f32 2.5000002, %v733_v20  ;;  %v762_v31 = vsub.f32 1.4, %v658_v2  ;;  %v768_v33 = vadd.f32 -1.0, %v658_v2  ;;  %v321_v38 = vmul.f32 1.25, %v684_v6  ;;  %p597_p10 = scmp.ne.s32.totalorder %s504_s1, %s596_s21  ;;  %p602_p12 = scmp.lt.s32.totalorder %s596_s21, %s596_s21 }
  0x29   :  { %v223_v30 = vsel %vm708_vm15, %v221_v24, 0.0  ;;  %v227_v36 = vmul.f32 2.5000002, %v749_v28  ;;  %v239_v37 = vsub.f32 1.8, %v656_v1  ;;  %v791_v40 = vadd.f32 %v216_v25, %v210_v22 }
  0x2a   :  { %v224_v35 = vsel %vm719_vm3, %v222_v27, 0.0  ;;  %v228_v41 = vmul.f32 2.5000002, %v762_v31  ;;  %v235_v42 = vmul.f32 2.5000002, %v765_v32  ;;  %v322_v47 = vmul.f32 1.25, %v693_v8  ;;  %p603_p13 = por %p602_p12, %p601_p11 }
  0x2b   :  { %v236_v43 = vmul.f32 2.5000002, %v768_v33  ;;  %v229_v44 = vsel %vm755_vm5, %v227_v36, 0.0  ;;  %v240_v45 = vsub.f32 1.8, %v658_v2  ;;  %v201_v49 = vsel %vm672_vm12, %v728_v18, 0.0 }
  0x2c   :  { %v241_v46 = vmul.f32 2.5000002, %v239_v37  ;;  %v230_v50 = vsel %vm774_vm6, %v228_v41, 0.0  ;;  %v231_v51 = vadd.f32 %v229_v44, %v223_v30  ;;  %v237_v52 = vsel %vm755_vm5, %v235_v42, 0.0  ;;  %v547_v53 = vld [vmem:[#allocation5 + $0x4] ss:$8 sps:$4 sm:$0xff]   ;;  %p604_p0 = pnand %p603_p13, %p597_p10 }
  0x2d   :  { %v238_v54 = vsel %vm774_vm6, %v236_v43, 0.0  ;;  %v242_v55 = vmul.f32 2.5000002, %v240_v45  ;;  %v534_v57 = vadd.f32 -1.4, %v656_v1  ;;  %v202_v58 = vsel %vm688_vm14, %v736_v21, 0.0  ;;  %538 = vmatprep.mubr.msk.bf16.mxu0 %vm451_vm2, %v547_v53 }
  0x2e   :  { %v243_v56 = vsel %vm787_vm7, %v241_v46, 0.0  ;;  %v232_v59 = vadd.f32 %v230_v50, %v224_v35  ;;  %v535_v61 = vadd.f32 -1.4, %v658_v2  ;;  %v323_v63 = vmul.f32 %v321_v38, %v745_v26 }
  0x2f   :  { %v823_v60 = vadd.f32 %v243_v56, %v237_v52  ;;  %v244_v62 = vsel %vm804_vm8, %v242_v55, 0.0  ;;  %v324_v12 = vmul.f32 %v322_v47, %v791_v40  ;;  %v325_v13 = vmul.f32 1.2500001, %v749_v28 }
  0x30   :  { %v832_v14 = vadd.f32 %v244_v62, %v238_v54  ;;  %v834_v7 = vmul.f32 2.5000002, %v534_v57  ;;  %v326_v15 = vmul.f32 1.2500001, %v762_v31  ;;  %v331_v16 = vmul.f32 1.2500001, %v702_v11 }
  0x31   :  { %v327_v17 = vmul.f32 %v325_v13, %v231_v51  ;;  %v332_v19 = vmul.f32 1.2500001, %v733_v20  ;;  %v335_v21 = vmul.f32 1.2500001, %v239_v37  ;;  %v315_v22 = vmul.f32 1.25, %v696_v9 }
  0x32   :  { %v840_v23 = vmul.f32 2.5000002, %v535_v61  ;;  %v328_v24 = vmul.f32 %v326_v15, %v232_v59  ;;  %v333_v25 = vmul.f32 %v331_v16, %v231_v51  ;;  %v336_v27 = vmul.f32 1.2500001, %v240_v45 }
  0x33   :  { %v329_v29 = vadd.f32 %v327_v17, %v323_v63  ;;  %v334_v30 = vmul.f32 %v332_v19, %v232_v59  ;;  %v337_v34 = vmul.f32 %v335_v21, %v823_v60  ;;  %v411_v35 = vmul.f32 0.8333334, %v684_v6 }
  0x34   :  { %v330_v36 = vadd.f32 %v328_v24, %v324_v12  ;;  %v338_v38 = vmul.f32 %v336_v27, %v832_v14  ;;  %v412_v41 = vmul.f32 0.8333334, %v693_v8  ;;  %v415_v42 = vmul.f32 0.8333334, %v239_v37 }
  0x35   :  { %v846_v43 = vadd.f32 %v337_v34, %v333_v25  ;;  %v413_v44 = vmul.f32 %v411_v35, %v329_v29  ;;  %v416_v46 = vmul.f32 0.8333334, %v240_v45  ;;  %vm85_vm9 = vcmp.ge.f32.partialorder %v656_v1, -0.2 }
  0x36   :  { %v849_v47 = vadd.f32 %v338_v38, %v334_v30  ;;  %v414_v50 = vmul.f32 %v412_v41, %v330_v36  ;;  %vm86_vm10 = vcmp.ge.f32.partialorder %v658_v2, -0.2  ;;  %vm87_vm11 = vcmp.lt.f32.partialorder %v656_v1, 0.2 }
  0x37   :  { %v417_v6 = vmul.f32 %v415_v42, %v846_v43  ;;  %vm88_vm13 = vcmp.lt.f32.partialorder %v658_v2, 0.2  ;;  %vm855_vm14 = vmand %vm85_vm9, %vm87_vm11  ;;  %v526_v37 = vadd.f32 0.2, %v656_v1  ;;  %v527_v45 = vadd.f32 0.2, %v658_v2 }
  0x38   :  { %v251_v51 = vsel %vm787_vm7, %v834_v7, 0.0  ;;  %v418_v52 = vmul.f32 %v416_v46, %v849_v47  ;;  %vm865_vm15 = vmand %vm86_vm10, %vm88_vm13  ;;  %v316_v54 = vmul.f32 1.25, %v699_v10  ;;  %v317_v55 = vmul.f32 %v315_v22, %v745_v26 }
  0x39   :  { %v419_v56 = vadd.f32 %v417_v6, %v413_v44  ;;  %v193_v57 = vmul.f32 2.5, %v526_v37  ;;  %v194_v59 = vmul.f32 2.5, %v527_v45  ;;  %v405_v61 = vmul.f32 0.8333334, %v749_v28 }
  0x3a   :  { %v420_v62 = vadd.f32 %v418_v52, %v414_v50  ;;  %v311_v63 = vmul.f32 1.25, %v526_v37  ;;  %v312_v12 = vmul.f32 1.25, %v527_v45  ;;  %v318_v13 = vmul.f32 %v316_v54, %v791_v40 }
  0x3b   :  { %v195_v15 = vsel %vm855_vm14, %v193_v57, 0.0  ;;  %v196_v16 = vsel %vm865_vm15, %v194_v59, 0.0  ;;  %v401_v17 = vmul.f32 0.8333333, %v526_v37  ;;  %v406_v19 = vmul.f32 0.8333334, %v762_v31 }
  0x3c   :  { %v438_v26 = vpack.c.bf16 %v420_v62, %v419_v56  ;;  %v203_v28 = vadd.f32 %v201_v49, %v195_v15  ;;  %v204_v21 = vadd.f32 %v202_v58, %v196_v16  ;;  %v402_v22 = vmul.f32 0.8333333, %v527_v45 }
  0x3d   :  { %v407_v24 = vmul.f32 %v405_v61, %v329_v29  ;;  %vm79_vm0 = vcmp.ge.f32.partialorder %v656_v1, -0.6  ;;  %vm80_vm1 = vcmp.ge.f32.partialorder %v658_v2, -0.6  ;;  %vm81_vm2 = vcmp.lt.f32.partialorder %v656_v1, -0.2 }
  0x3e   :  { %456 = vmatpush1.bf16.msra.mxu0 %v438_v26  ;;  %v313_v40 = vmul.f32 %v311_v63, %v203_v28  ;;  %v314_v25 = vmul.f32 %v312_v12, %v204_v21  ;;  %vm82_vm3 = vcmp.lt.f32.partialorder %v658_v2, -0.2  ;;  %v524_v31 = vadd.f32 0.6, %v656_v1  ;;  %vm888_vm12 = vmand %vm79_vm0, %vm81_vm2 }
  0x3f   :  { %457 = vmatprep.subr.bf16.mxu0 %v626_v0  ;;  %v408_v3 = vmul.f32 %v406_v19, %v330_v36  ;;  %v525_v49 = vadd.f32 0.6, %v658_v2  ;;  %v894_v58 = vsub.f32 0.2, %v656_v1  ;;  %v897_v27 = vsub.f32 0.2, %v658_v2  ;;  %vm901_vm4 = vmand %vm80_vm1, %vm82_vm3 }
  0x40   :  { %v319_v29 = vadd.f32 %v317_v55, %v313_v40  ;;  %v320_v30 = vadd.f32 %v318_v13, %v314_v25  ;;  %v179_v35 = vmul.f32 2.4999998, %v524_v31  ;;  %v301_v36 = vmul.f32 1.25, %v524_v31 }
  0x41   :  { %v180_v38 = vmul.f32 2.4999998, %v525_v49  ;;  %v185_v41 = vmul.f32 2.5, %v894_v58  ;;  %v186_v42 = vmul.f32 2.5, %v897_v27  ;;  %v302_v44 = vmul.f32 1.25, %v525_v49 }
  0x42   :  { %v403_v46 = vmul.f32 %v401_v17, %v319_v29  ;;  %v404_v50 = vmul.f32 %v402_v22, %v320_v30  ;;  %v181_v6 = vsel %vm888_vm12, %v179_v35, 0.0  ;;  %v305_v37 = vmul.f32 1.25, %v678_v4 }
  0x43   :  { %v182_v45 = vsel %vm901_vm4, %v180_v38, 0.0  ;;  %v187_v52 = vsel %vm855_vm14, %v185_v41, 0.0  ;;  %v188_v54 = vsel %vm865_vm15, %v186_v42, 0.0  ;;  %v306_v55 = vmul.f32 1.25, %v681_v5 }
  0x44   :  { %v409_v56 = vadd.f32 %v407_v24, %v403_v46  ;;  %v410_v57 = vadd.f32 %v408_v3, %v404_v50  ;;  %v189_v59 = vadd.f32 %v187_v52, %v181_v6  ;;  %v190_v61 = vadd.f32 %v188_v54, %v182_v45 }
  0x45   :  { %v307_v62 = vmul.f32 %v305_v37, %v203_v28  ;;  %v308_v63 = vmul.f32 %v306_v55, %v204_v21  ;;  %v391_v12 = vmul.f32 0.8333333, %v524_v31  ;;  %v392_v13 = vmul.f32 0.8333333, %v525_v49 }
  0x46   :  { %v437_v15 = vpack.c.bf16 %v410_v57, %v409_v56  ;;  %v303_v16 = vmul.f32 %v301_v36, %v189_v59  ;;  %v304_v17 = vmul.f32 %v302_v44, %v190_v61  ;;  %v395_v19 = vmul.f32 0.8333333, %v696_v9 }
  0x47   :  { %v396_v8 = vmul.f32 0.8333333, %v699_v10  ;;  %vm73_vm5 = vcmp.ge.f32.partialorder %v656_v1, -1.0  ;;  %vm74_vm6 = vcmp.ge.f32.partialorder %v658_v2, -1.0  ;;  %vm75_vm9 = vcmp.lt.f32.partialorder %v656_v1, -0.6 }
  0x48   :  { %458 = vmatpush1.bf16.msra.mxu0 %v437_v15  ;;  %v309_v53 = vadd.f32 %v307_v62, %v303_v16  ;;  %v310_v26 = vadd.f32 %v308_v63, %v304_v17  ;;  %v397_v28 = vmul.f32 %v395_v19, %v319_v29  ;;  %vm76_vm10 = vcmp.lt.f32.partialorder %v658_v2, -0.6  ;;  %vm924_vm11 = vmand %vm73_vm5, %vm75_vm9 }
  0x49   :  { %459 = vmatprep.subr.bf16.mxu0 %v626_v0  ;;  %v398_v21 = vmul.f32 %v396_v8, %v320_v30  ;;  %v522_v9 = vadd.f32 1.0, %v656_v1  ;;  %v523_v10 = vadd.f32 1.0, %v658_v2  ;;  %v931_v24 = vsub.f32 -0.2, %v656_v1  ;;  %vm935_vm13 = vmand %vm74_vm6, %vm76_vm10 }
  0x4a   :  { %v393_v40 = vmul.f32 %v391_v12, %v309_v53  ;;  %v394_v25 = vmul.f32 %v392_v13, %v310_v26  ;;  %v940_v3 = vsub.f32 -0.2, %v658_v2  ;;  %v295_v49 = vmul.f32 1.25, %v894_v58 }
  0x4b   :  { %v165_v29 = vmul.f32 2.5000002, %v522_v9  ;;  %v166_v30 = vmul.f32 2.5000002, %v523_v10  ;;  %v171_v35 = vmul.f32 2.4999998, %v931_v24 }
  0x4c   :  { %v399_v36 = vadd.f32 %v397_v28, %v393_v40  ;;  %v400_v38 = vadd.f32 %v398_v21, %v394_v25  ;;  %v172_v41 = vmul.f32 2.4999998, %v940_v3  ;;  %v291_v42 = vmul.f32 1.25, %v522_v9 }
  0x4d   :  { %v167_v44 = vsel %vm924_vm11, %v165_v29, 0.0  ;;  %v168_v46 = vsel %vm935_vm13, %v166_v30, 0.0  ;;  %v173_v50 = vsel %vm888_vm12, %v171_v35, 0.0  ;;  %v292_v6 = vmul.f32 1.25, %v523_v10 }
  0x4e   :  { %v436_v37 = vpack.c.bf16 %v400_v38, %v399_v36  ;;  %v174_v45 = vsel %vm901_vm4, %v172_v41, 0.0  ;;  %v175_v52 = vadd.f32 %v173_v50, %v167_v44  ;;  %v296_v54 = vmul.f32 1.25, %v897_v27 }
  0x4f   :  { %v176_v55 = vadd.f32 %v174_v45, %v168_v46  ;;  %v297_v56 = vmul.f32 %v295_v49, %v189_v59  ;;  %v381_v57 = vmul.f32 0.8333333, %v522_v9  ;;  %v382_v62 = vmul.f32 0.8333333, %v523_v10 }
  0x50   :  { %460 = vmatpush1.bf16.msra.mxu0 %v436_v37  ;;  %v293_v63 = vmul.f32 %v291_v42, %v175_v52  ;;  %v298_v12 = vmul.f32 %v296_v54, %v190_v61  ;;  %v385_v13 = vmul.f32 0.8333333, %v678_v4  ;;  %v386_v18 = vmul.f32 0.8333333, %v681_v5 }
  0x51   :  { %461 = vmatprep.subr.bf16.mxu0 %v626_v0  ;;  %v294_v15 = vmul.f32 %v292_v6, %v176_v55  ;;  %vm67_vm14 = vcmp.ge.f32.partialorder %v656_v1, -1.4  ;;  %vm68_vm15 = vcmp.ge.f32.partialorder %v658_v2, -1.4  ;;  %vm69_vm0 = vcmp.lt.f32.partialorder %v656_v1, -1.0 }
  0x52   :  { %v299_v34 = vadd.f32 %v297_v56, %v293_v63  ;;  %v387_v59 = vmul.f32 %v385_v13, %v309_v53  ;;  %v388_v16 = vmul.f32 %v386_v18, %v310_v26  ;;  %vm70_vm1 = vcmp.lt.f32.partialorder %v658_v2, -1.0  ;;  %vm961_vm2 = vmand %vm67_vm14, %vm69_vm0 }
  0x53   :  { %v300_v17 = vadd.f32 %v298_v12, %v294_v15  ;;  %v520_v4 = vadd.f32 1.4, %v656_v1  ;;  %v521_v5 = vadd.f32 1.4, %v658_v2  ;;  %v968_v19 = vsub.f32 -0.6, %v656_v1  ;;  %vm970_vm3 = vmand %vm68_vm15, %vm70_vm1 }
  0x54   :  { %v383_v8 = vmul.f32 %v381_v57, %v299_v34  ;;  %v975_v53 = vsub.f32 -0.6, %v658_v2  ;;  %v285_v26 = vmul.f32 1.25, %v931_v24  ;;  %v286_v21 = vmul.f32 1.25, %v940_v3 }
  0x55   :  { %v384_v9 = vmul.f32 %v382_v62, %v300_v17  ;;  %v151_v10 = vmul.f32 2.5000002, %v520_v4  ;;  %v152_v40 = vmul.f32 2.5000002, %v521_v5  ;;  %v157_v25 = vmul.f32 2.5000002, %v968_v19 }
  0x56   :  { %v389_v49 = vadd.f32 %v387_v59, %v383_v8  ;;  %v158_v29 = vmul.f32 2.5000002, %v975_v53  ;;  %v281_v30 = vmul.f32 1.2500001, %v520_v4  ;;  %v282_v35 = vmul.f32 1.2500001, %v521_v5 }
  0x57   :  { %v390_v36 = vadd.f32 %v388_v16, %v384_v9  ;;  %v153_v38 = vsel %vm961_vm2, %v151_v10, 0.0  ;;  %v154_v41 = vsel %vm970_vm3, %v152_v40, 0.0  ;;  %v159_v42 = vsel %vm924_vm11, %v157_v25, 0.0 }
  0x58   :  { %v160_v44 = vsel %vm935_vm13, %v158_v29, 0.0  ;;  %v161_v46 = vadd.f32 %v159_v42, %v153_v38  ;;  %v287_v50 = vmul.f32 %v285_v26, %v175_v52  ;;  %v288_v6 = vmul.f32 %v286_v21, %v176_v55 }
  0x59   :  { %v435_v37 = vpack.c.bf16 %v390_v36, %v389_v49  ;;  %v162_v45 = vadd.f32 %v160_v44, %v154_v41  ;;  %v371_v54 = vmul.f32 0.8333334, %v520_v4  ;;  %v372_v56 = vmul.f32 0.8333334, %v521_v5 }
  0x5a   :  { %v283_v57 = vmul.f32 %v281_v30, %v161_v46  ;;  %v375_v62 = vmul.f32 0.8333333, %v894_v58  ;;  %v376_v63 = vmul.f32 0.8333333, %v897_v27  ;;  %vm61_vm12 = vcmp.ge.f32.partialorder %v656_v1, -1.8 }
  0x5b   :  { %462 = vmatpush1.bf16.msra.mxu0 %v435_v37  ;;  %v284_v22 = vmul.f32 %v282_v35, %v162_v45  ;;  %vm62_vm4 = vcmp.ge.f32.partialorder %v658_v2, -1.8  ;;  %vm63_vm5 = vcmp.lt.f32.partialorder %v656_v1, -1.4  ;;  %vm64_vm6 = vcmp.lt.f32.partialorder %v658_v2, -1.4 }
  0x5c   :  { %463 = vmatprep.subr.bf16.mxu0 %v626_v0  ;;  %v289_v31 = vadd.f32 %v287_v50, %v283_v57  ;;  %v377_v52 = vmul.f32 %v375_v62, %v299_v34  ;;  %v378_v55 = vmul.f32 %v376_v63, %v300_v17  ;;  %v518_v12 = vadd.f32 1.8, %v656_v1  ;;  %vm997_vm9 = vmand %vm61_vm12, %vm63_vm5 }
  0x5d   :  { %v290_v58 = vadd.f32 %v288_v6, %v284_v22  ;;  %v519_v13 = vadd.f32 1.8, %v658_v2  ;;  %v141_v18 = vsub.f32 -1.0, %v656_v1  ;;  %v142_v15 = vsub.f32 -1.0, %v658_v2  ;;  %vm1004_vm10 = vmand %vm62_vm4, %vm64_vm6 }
  0x5e   :  { %v373_v59 = vmul.f32 %v371_v54, %v289_v31  ;;  %v137_v34 = vmul.f32 2.5000002, %v518_v12  ;;  %v271_v17 = vmul.f32 1.2500001, %v518_v12  ;;  %v275_v4 = vmul.f32 1.2500001, %v968_v19 }
  0x5f   :  { %v374_v5 = vmul.f32 %v372_v56, %v290_v58  ;;  %v138_v8 = vmul.f32 2.5000002, %v519_v13  ;;  %v143_v26 = vmul.f32 2.5000002, %v141_v18  ;;  %v144_v21 = vmul.f32 2.5000002, %v142_v15 }
  0x60   :  { %v379_v9 = vadd.f32 %v377_v52, %v373_v59  ;;  %v139_v10 = vsel %vm997_vm9, %v137_v34, 0.0  ;;  %v272_v40 = vmul.f32 1.2500001, %v519_v13  ;;  %v276_v25 = vmul.f32 1.2500001, %v975_v53 }
  0x61   :  { %v380_v49 = vadd.f32 %v378_v55, %v374_v5  ;;  %v140_v29 = vsel %vm1004_vm10, %v138_v8, 0.0  ;;  %v145_v30 = vsel %vm961_vm2, %v143_v26, 0.0  ;;  %v146_v35 = vsel %vm970_vm3, %v144_v21, 0.0 }
  0x62   :  { %v147_v36 = vadd.f32 %v145_v30, %v139_v10  ;;  %v148_v38 = vadd.f32 %v146_v35, %v140_v29  ;;  %v277_v41 = vmul.f32 %v275_v4, %v161_v46  ;;  %v278_v42 = vmul.f32 %v276_v25, %v162_v45 }
  0x63   :  { %v434_v44 = vpack.c.bf16 %v380_v49, %v379_v9  ;;  %v361_v50 = vmul.f32 0.8333334, %v518_v12  ;;  %v362_v6 = vmul.f32 0.8333334, %v519_v13  ;;  %v365_v37 = vmul.f32 0.8333334, %v931_v24 }
  0x64   :  { %v273_v54 = vmul.f32 %v271_v17, %v147_v36  ;;  %v274_v56 = vmul.f32 %v272_v40, %v148_v38  ;;  %v366_v57 = vmul.f32 0.8333334, %v940_v3  ;;  %vm55_vm11 = vcmp.ge.f32.partialorder %v656_v1, -2.2 }
  0x65   :  { %464 = vmatpush1.bf16.msra.mxu0 %v434_v44  ;;  %v367_v61 = vmul.f32 %v365_v37, %v289_v31  ;;  %vm56_vm13 = vcmp.ge.f32.partialorder %v658_v2, -2.2  ;;  %vm57_vm14 = vcmp.lt.f32.partialorder %v656_v1, -1.8  ;;  %vm58_vm15 = vcmp.lt.f32.partialorder %v658_v2, -1.8 }
  0x66   :  { %465 = vmatprep.subr.bf16.mxu0 %v626_v0  ;;  %v279_v28 = vadd.f32 %v277_v41, %v273_v54  ;;  %v280_v46 = vadd.f32 %v278_v42, %v274_v56  ;;  %v368_v45 = vmul.f32 %v366_v57, %v290_v58  ;;  %v516_v24 = vadd.f32 2.2, %v656_v1  ;;  %vm1028_vm0 = vmand %vm55_vm11, %vm57_vm14 }
  0x67   :  { %v517_v3 = vadd.f32 2.2, %v658_v2  ;;  %v127_v63 = vsub.f32 -1.4, %v656_v1  ;;  %v128_v22 = vsub.f32 -1.4, %v658_v2  ;;  %vm1035_vm1 = vmand %vm56_vm13, %vm58_vm15 }
  0x68   :  { %v363_v31 = vmul.f32 %v361_v50, %v279_v28  ;;  %v364_v52 = vmul.f32 %v362_v6, %v280_v46  ;;  %v123_v12 = vmul.f32 2.4999995, %v516_v24  ;;  %v261_v58 = vmul.f32 1.2499999, %v516_v24 }
  0x69   :  { %v124_v13 = vmul.f32 2.4999995, %v517_v3  ;;  %v129_v59 = vmul.f32 2.5000002, %v127_v63  ;;  %v130_v34 = vmul.f32 2.5000002, %v128_v22 }
  0x6a   :  { %v369_v17 = vadd.f32 %v367_v61, %v363_v31  ;;  %v370_v4 = vadd.f32 %v368_v45, %v364_v52  ;;  %v125_v5 = vsel %vm1028_vm0, %v123_v12, 0.0  ;;  %v262_v8 = vmul.f32 1.2499999, %v517_v3 }
  0x6b   :  { %v126_v26 = vsel %vm1035_vm1, %v124_v13, 0.0  ;;  %v131_v21 = vsel %vm997_vm9, %v129_v59, 0.0  ;;  %v132_v9 = vsel %vm1004_vm10, %v130_v34, 0.0  ;;  %v265_v10 = vmul.f32 1.2500001, %v141_v18 }
  0x6c   :  { %v433_v40 = vpack.c.bf16 %v370_v4, %v369_v17  ;;  %v133_v25 = vadd.f32 %v131_v21, %v125_v5  ;;  %v134_v49 = vadd.f32 %v132_v9, %v126_v26  ;;  %v266_v29 = vmul.f32 1.2500001, %v142_v15 }
  0x6d   :  { %v267_v30 = vmul.f32 %v265_v10, %v147_v36  ;;  %v351_v35 = vmul.f32 0.8333333, %v516_v24  ;;  %v352_v41 = vmul.f32 0.8333333, %v517_v3  ;;  %v355_v42 = vmul.f32 0.8333334, %v968_v19 }
  0x6e   :  { %466 = vmatpush1.bf16.msra.mxu0 %v433_v40  ;;  %v263_v44 = vmul.f32 %v261_v58, %v133_v25  ;;  %v264_v50 = vmul.f32 %v262_v8, %v134_v49  ;;  %v268_v27 = vmul.f32 %v266_v29, %v148_v38  ;;  %v356_v6 = vmul.f32 0.8333334, %v975_v53 }
  0x6f   :  { %467 = vmatprep.subr.bf16.mxu0 %v626_v0  ;;  %v357_v18 = vmul.f32 %v355_v42, %v279_v28  ;;  %v43_v16 = vsub.f32 0.0, %v656_v1  ;;  %v44_v37 = vsub.f32 0.0, %v658_v2  ;;  %vm115_vm2 = vcmp.ge.f32.partialorder %v656_v1, 1.8 }
  0x70   :  { %v269_v15 = vadd.f32 %v267_v30, %v263_v44  ;;  %v270_v36 = vadd.f32 %v268_v27, %v264_v50  ;;  %v358_v54 = vmul.f32 %v356_v6, %v280_v46  ;;  %vm116_vm3 = vcmp.ge.f32.partialorder %v658_v2, 1.8 }
  0x71   :  { %v45_v19 = vmul.f32 1.442695, %v43_v16  ;;  %v47_v56 = vmul.f32 1.442695, %v44_v37  ;;  %vm117_vm12 = vcmp.lt.f32.partialorder %v656_v1, 2.2 }
  0x72   :  { %v353_v38 = vmul.f32 %v351_v35, %v269_v15  ;;  %v354_v53 = vmul.f32 %v352_v41, %v270_v36  ;;  %vm118_vm4 = vcmp.lt.f32.partialorder %v658_v2, 2.2  ;;  %v253_v57 = vsub.f32 2.2, %v656_v1  ;;  %vm1059_vm5 = vmand %vm115_vm2, %vm117_vm12 }
  0x73   :  { %548 = vpow2.f32 %v45_v19  ;;  %v254_v28 = vsub.f32 2.2, %v658_v2  ;;  %v341_v46 = vmul.f32 1.2500001, %v765_v32  ;;  %v342_v45 = vmul.f32 1.2500001, %v768_v33  ;;  %vm120_vm6 = vmand %vm116_vm3, %vm118_vm4 }
  0x74   :  { %v359_v24 = vadd.f32 %v357_v18, %v353_v38  ;;  %v360_v62 = vadd.f32 %v358_v54, %v354_v53  ;;  %550 = vpow2.f32 %v47_v56  ;;  %v255_v3 = vmul.f32 2.4999995, %v253_v57 }
  0x75   :  { %v252_v63 = vsel %vm804_vm8, %v840_v23, 0.0  ;;  %v256_v22 = vmul.f32 2.4999995, %v254_v28  ;;  %v345_v31 = vmul.f32 1.2499999, %v253_v57  ;;  %v343_v58 = vmul.f32 %v341_v46, %v823_v60 }
  0x76   :  { %v432_v52 = vpack.c.bf16 %v360_v62, %v359_v24  ;;  %v257_v55 = vsel %vm1059_vm5, %v255_v3, 0.0  ;;  %v346_v32 = vmul.f32 1.2499999, %v254_v28  ;;  %v421_v13 = vmul.f32 0.8333334, %v702_v11 }
  0x77   :  { %v258_v12 = vsel %vm120_vm6, %v256_v22, 0.0  ;;  %v259_v33 = vadd.f32 %v257_v55, %v251_v51  ;;  %v344_v23 = vmul.f32 %v342_v45, %v832_v14  ;;  %v422_v59 = vmul.f32 0.8333334, %v733_v20 }
  0x78   :  { %468 = vmatpush1.bf16.msra.mxu0 %v432_v52  ;;  %v260_v48 = vadd.f32 %v258_v12, %v252_v63  ;;  %v425_v17 = vmul.f32 0.8333333, %v253_v57  ;;  %v426_v5 = vmul.f32 0.8333333, %v254_v28  ;;  %v423_v7 = vmul.f32 %v421_v13, %v846_v43 }
  0x79   :  { %469 = vmatprep.subr.bf16.mxu0 %v626_v0  ;;  %v347_v34 = vmul.f32 %v345_v31, %v259_v33  ;;  %v424_v60 = vmul.f32 %v422_v59, %v849_v47  ;;  %v545_v47 = vld [vmem:[#allocation5] ss:$8 sps:$4 sm:$0xff]  }
  0x7a   :  { %v348_v4 = vmul.f32 %v346_v32, %v260_v48 }
  0x7b   :  { %v349_v39 = vadd.f32 %v347_v34, %v343_v58 }
  0x7c   :  { %v350_v51 = vadd.f32 %v348_v4, %v344_v23 }
  0x7d   :  { %v427_v8 = vmul.f32 %v425_v17, %v349_v39 }
  0x7e   :  { %v428_v11 = vmul.f32 %v426_v5, %v350_v51 }
  0x7f   :  { %v429_v26 = vadd.f32 %v427_v8, %v423_v7 }
  0x80   :  { %v549_v21 = vpop.eup %548  ;;  %v430_v9 = vadd.f32 %v428_v11, %v424_v60 }
  0x81   :  { %v551_v14 = vpop.eup %550  ;;  %v49_v10 = vadd.f32 1.0, %v549_v21 }
  0x82   :  { %v50_v20 = vadd.f32 1.0, %v551_v14  ;;  %v439_v40 = vpack.c.bf16 %v430_v9, %v429_v26 }
  0x83   :  { %552 = vrcp.f32 %v49_v10 }
  0x84   :  { %554 = vrcp.f32 %v50_v20 }
  0x90   :  { %v553_v25 = vpop.eup %552 }
  0x91   :  { %v555_v49 = vpop.eup %554  ;;  %v53_v29 = vmul.f32 %v553_v25, %v656_v1 }
  0x92   :  { %v54_v43 = vmul.f32 %v555_v49, %v658_v2 }
  0x94   :  { %v431_v30 = vpack.c.bf16 %v54_v43, %v53_v29 }
  0x96   :  { %470 = vmatpush1.bf16.msra.mxu0 %v431_v30 }
  0x97   :  { %485 = vmatprep.subr.bf16.mxu0 %v626_v0 }
  0x9a   :  { %486 = vmatpush2.bf16.msra.mxu0 %v439_v40 }
  0x9d   :  { %488 = vmatmul.mubr.bf16.vlgmr.msra.gmra.mxu0 %v545_v47 }
 0x15d   :  { %v489_v35 = vpop.f32.mrf.mxu0 }
 0x15e   :  { %496 = vst [vmem:[#allocation7] sm:$0xff] %v489_v35 }
 0x15f   :  { %v491_v41 = vpop.f32.mrf.mxu0 }
 0x161   :  { %v492_v42 = vpop.f32.mrf.mxu0 }
 0x162   :  { %497 = vst [vmem:[#allocation7 + $0x8] sm:$0xff] %v492_v42 }
 0x163   :  { %v494_v44 = vpop.f32.mrf.mxu0 }
 0x164   :  { %607 = shalt.err (!%p604_p0)
}
 0x165   :  { %509 = dma.vmem_to_hbm [thread:$0]  %s504_s1, 256, %s1095_s2, [#allocation4], %s623_s12, %s623_s12, %s624_s13  }
 0x166   :  { %620 = dma.done.wait [#allocation4], 256  }
 0x167   :  { %621 = vsyncadd [#allocation4], 4294967040 }
 0x168   :  { %513 = vsyncpa [#allocation3], 1 }
 0x169   :  { %514 = vsyncpa [#allocation6], 1 }
 0x16a   :  { %515 = vsyncpa [#allocation4], 1 }

</bundles_post_ra>
